<compile_context>
chip_gen: v7x
topology: tpu7x:2x2x1
jax: 0.10.0
libtpu: 0.0.40
codegen_flags: <defaults>
</compile_context>

<pallas_src>
import jax
import jax.numpy as jnp
from jax.experimental import pallas as pl
from jax.experimental.pallas import tpu as pltpu

LANE = 128                        # TPU lane width (last dim of every tile)
MAX_TILE_ROWS = 4096              # 4096*128*4B = 2 MiB per f32 tile
ACC_ROWS = 64                     # (64,128) f32 accumulator -> 64-way add ILP
MIN_KERNEL_ELEMENTS = 128 * 1024  # below this, plain jnp is cheaper


def _round_down(x, m):
    return (x // m) * m


def _is_v7x():
    """Best-effort detection of a 2-TensorCore (v7x-class) chip."""
    try:
        kind = jax.devices()[0].device_kind.lower()
        return ("v7" in kind) or ("tpu7" in kind)
    except Exception:
        return False


def _make_sse_kernel(valid_rows, needs_mask):
    """Builds the SSE reduction kernel.

    valid_rows : static total number of valid rows in the (rows, LANE) slab.
    needs_mask : static bool; True iff some grid step sees a partial /
                 out-of-range tile (its invalid rows must be zeroed).
    """

    def kernel(p_ref, t_ref, o_ref, acc_ref):
        # p_ref, t_ref : (tile_rows, LANE) tiles in VMEM (native dtype)
        # o_ref        : (1, 1) f32 per-core output block in SMEM
        # acc_ref      : (acc_rows, LANE) f32 running accumulator in VMEM
        i = pl.program_id(1)           # reduction ("arbitrary") axis
        inner = pl.num_programs(1)

        @pl.when(i == 0)
        def _():
            acc_ref[...] = jnp.zeros_like(acc_ref)

        d = p_ref[...].astype(jnp.float32) - t_ref[...].astype(jnp.float32)
        sq = d * d

        if needs_mask:
            # Zero rows beyond the valid extent.  Partial blocks are read with
            # clamped DMAs, so the tail of the VMEM buffer holds garbage; the
            # select discards it (limit <= 0 kills fully out-of-range steps).
            tile_rows = p_ref.shape[0]
            g = pl.program_id(0) * inner + i          # unclamped global step
            limit = valid_rows - g * tile_rows        # valid rows in this tile
            row_ids = jax.lax.broadcasted_iota(jnp.int32, sq.shape, 0)
            sq = jnp.where(row_ids < limit, sq, 0.0)

        # Fold the tile into the wide accumulator: independent VPU add chains
        # per (8,128) vreg, fully hidden under the HBM DMA.
        acc_rows = acc_ref.shape[0]
        acc_ref[...] += jnp.sum(sq.reshape(-1, acc_rows, LANE), axis=0)

        @pl.when(i == inner - 1)
        def _():
            # Single cross-lane/sublane reduce + scalar store, once per core.
            o_ref[0, 0] = jnp.sum(acc_ref[...])

    return kernel


def multi_class_loss(preds, trues, *, min_kernel_elements=MIN_KERNEL_ELEMENTS):
    """JAX/Pallas equivalent of torch.sum(torch.pow(preds - trues, 2))."""
    assert preds.shape == trues.shape, "preds and trues must have the same shape"

    n = int(preds.size)
    if n == 0:
        return jnp.zeros((), jnp.float32)

    # Small-n fallback: one tile of work is not worth the pallas_call overhead.
    if n < min_kernel_elements:
        d = preds.astype(jnp.float32) - trues.astype(jnp.float32)
        return jnp.sum(d * d)

    rows = pl.cdiv(n, LANE)
    padded = rows * LANE

    def to_slab(x):
        flat = x.reshape(-1)                      # free for contiguous arrays
        if padded != n:
            # Ragged element count only: pad < LANE zeros (zeros in BOTH
            # inputs contribute nothing to the squared-error sum).
            flat = jnp.pad(flat, (0, padded - n))
        return flat.reshape(rows, LANE)           # native dtype, no astype

    p2d = to_slab(preds)
    t2d = to_slab(trues)

    # 2-way TensorCore split only on v7x-class chips and only with enough work.
    ncores = 2 if (_is_v7x() and rows >= 4 * MAX_TILE_ROWS) else 1

    # Tile sizing: tiles never exceed the array's row extent, so only the
    # standard "partial last block" path is exercised.  Rows per tile are a
    # multiple of 64 (covers f32/bf16/int8 sublane packing and matches the
    # accumulator width), except for tiny inputs which use one full-extent
    # block.
    if rows < ACC_ROWS:
        tile_rows = rows
        acc_rows = rows
    else:
        per_core = pl.cdiv(rows, ncores)
        tile_rows = min(MAX_TILE_ROWS,
                        max(ACC_ROWS, _round_down(per_core, ACC_ROWS)))
        acc_rows = ACC_ROWS

    nblocks = pl.cdiv(rows, tile_rows)
    inner_steps = pl.cdiv(nblocks, ncores)
    max_block = nblocks - 1
    needs_mask = (ncores * inner_steps * tile_rows) != rows

    # Clamp the block index so every DMA stays in-bounds; any duplicated
    # (clamped) step is fully masked to zero inside the kernel.
    def idx_map(c, i):
        return (jnp.minimum(c * inner_steps + i, max_block), 0)

    in_spec = pl.BlockSpec((tile_rows, LANE), idx_map)

    cost = pl.CostEstimate(
        flops=3 * n,
        transcendentals=0,
        bytes_accessed=n * (preds.dtype.itemsize + trues.dtype.itemsize) + 4,
    )

    partials = pl.pallas_call(
        _make_sse_kernel(rows, needs_mask),
        out_shape=jax.ShapeDtypeStruct((ncores, 1), jnp.float32),
        grid_spec=pltpu.PrefetchScalarGridSpec(
            num_scalar_prefetch=0,
            grid=(ncores, inner_steps),
            in_specs=[in_spec, in_spec],
            out_specs=pl.BlockSpec(
                (1, 1), lambda c, i: (c, 0), memory_space=pltpu.SMEM
            ),
            scratch_shapes=[pltpu.VMEM((acc_rows, LANE), jnp.float32)],
        ),
        compiler_params=pltpu.CompilerParams(
            dimension_semantics=("parallel", "arbitrary"),
        ),
        cost_estimate=cost,
    )(p2d, t2d)

    return jnp.sum(partials)


if __name__ == "__main__":
    key = jax.random.PRNGKey(0)
    kp, kt = jax.random.split(key)

    # Small NCHW-shaped inputs consistent with a segmentation-style loss.
    shape = (2, 4, 16, 16)
    preds = jax.random.normal(kp, shape, dtype=jnp.float32)
    trues = jax.random.normal(kt, shape, dtype=jnp.float32)
    ref = jnp.sum((preds - trues) ** 2)

    # Default path for this size is the small-n fallback; also force the
    # Pallas kernel to make sure it is exercised at small shapes.
    loss_fb = multi_class_loss(preds, trues)
    loss_kn = multi_class_loss(preds, trues, min_kernel_elements=0)
    jax.block_until_ready((loss_fb, loss_kn))
    assert jnp.allclose(loss_fb, ref, rtol=1e-5, atol=1e-5), (loss_fb, ref)
    assert jnp.allclose(loss_kn, ref, rtol=1e-5, atol=1e-5), (loss_kn, ref)

    # LANE-aligned, multi-block case whose last block is partial (exercises
    # the in-kernel tail masking, no wrapper pad).
    s2 = (4, 300, 128)
    p2 = jax.random.normal(kp, s2, dtype=jnp.float32)
    t2 = jax.random.normal(kt, s2, dtype=jnp.float32)
    l2 = multi_class_loss(p2, t2)
    jax.block_until_ready(l2)
    r2 = jnp.sum((p2 - t2) ** 2)
    assert jnp.allclose(l2, r2, rtol=1e-4, atol=1e-3), (l2, r2)

    # Ragged element count (n % 128 != 0): exercises the tiny LANE-pad path.
    s3 = (3, 7, 123, 130)
    p3 = jax.random.normal(kp, s3, dtype=jnp.float32)
    t3 = jax.random.normal(kt, s3, dtype=jnp.float32)
    l3 = multi_class_loss(p3, t3)
    jax.block_until_ready(l3)
    r3 = jnp.sum((p3 - t3) ** 2)
    assert jnp.allclose(l3, r3, rtol=1e-4, atol=1e-3), (l3, r3)

    # bf16 inputs: native-dtype DMA, in-kernel upcast to f32.
    pb = p2.astype(jnp.bfloat16)
    tb = t2.astype(jnp.bfloat16)
    lb = multi_class_loss(pb, tb)
    jax.block_until_ready(lb)
    rb = jnp.sum((pb.astype(jnp.float32) - tb.astype(jnp.float32)) ** 2)
    assert jnp.allclose(lb, rb, rtol=1e-3, atol=1e-2), (lb, rb)

    print("KERNEL_OK")
</pallas_src>

<mosaic_0001>
module attributes {stable_mosaic.version = 11 : i64} {
  func.func @kernel(%arg0: i32, %arg1: i32, %arg2: memref<16x128xf32, #tpu.memory_space<vmem>>, %arg3: memref<16x128xf32, #tpu.memory_space<vmem>>, %arg4: memref<1x1xf32, #tpu.memory_space<smem>>, %arg5: memref<16x128xf32, #tpu.memory_space<vmem>>) attributes {dimension_semantics = [#tpu.dimension_semantics<parallel>, #tpu.dimension_semantics<arbitrary>], iteration_bounds = array<i64: 1, 1>, scalar_prefetch = 0 : i64, scratch_operands = 1 : i64, tpu.core_type = #tpu.core_type<tc>, window_params = [{transform_indices = @transform_0, window_bounds = array<i64: 16, 128>}, {transform_indices = @transform_1, window_bounds = array<i64: 16, 128>}, {transform_indices = @transform_2, window_bounds = array<i64: 1, 1>}]} {
    %c0_i32 = arith.constant 0 : i32
    %0 = arith.cmpi eq, %arg1, %c0_i32 : i32
    %1 = arith.extui %0 : i1 to i32
    %c0_i32_0 = arith.constant 0 : i32
    %2 = arith.cmpi ne, %1, %c0_i32_0 : i32
    scf.if %2 {
      %cst_10 = arith.constant 0.000000e+00 : f32
      %15 = vector.broadcast %cst_10 : f32 to vector<16x128xf32>
      %c0_11 = arith.constant 0 : index
      %c0_12 = arith.constant 0 : index
      %16 = vector.load %arg5[%c0_11, %c0_12] : memref<16x128xf32, #tpu.memory_space<vmem>>, vector<16x128xf32>
      tpu.vector_store %arg5[%c0_11, %c0_12], %15 {strides = array<i32>} : memref<16x128xf32, #tpu.memory_space<vmem>>, vector<16x128xf32>,
    } else {
    }
    %c0 = arith.constant 0 : index
    %c0_1 = arith.constant 0 : index
    %3 = vector.load %arg2[%c0, %c0_1] : memref<16x128xf32, #tpu.memory_space<vmem>>, vector<16x128xf32>
    %c0_2 = arith.constant 0 : index
    %c0_3 = arith.constant 0 : index
    %4 = vector.load %arg3[%c0_2, %c0_3] : memref<16x128xf32, #tpu.memory_space<vmem>>, vector<16x128xf32>
    %5 = arith.subf %3, %4 : vector<16x128xf32>
    %6 = arith.mulf %5, %5 : vector<16x128xf32>
    %c0_4 = arith.constant 0 : index
    %c0_5 = arith.constant 0 : index
    %7 = vector.load %arg5[%c0_4, %c0_5] : memref<16x128xf32, #tpu.memory_space<vmem>>, vector<16x128xf32>
    %8 = vector.shape_cast %6 : vector<16x128xf32> to vector<1x16x128xf32>
    %cst = arith.constant dense<0.000000e+00> : vector<16x128xf32>
    %9 = vector.multi_reduction <add>, %8, %cst [0] : vector<1x16x128xf32> to vector<16x128xf32>
    %10 = arith.addf %7, %9 : vector<16x128xf32>
    %c0_6 = arith.constant 0 : index
    %c0_7 = arith.constant 0 : index
    %11 = vector.load %arg5[%c0_6, %c0_7] : memref<16x128xf32, #tpu.memory_space<vmem>>, vector<16x128xf32>
    tpu.vector_store %arg5[%c0_6, %c0_7], %10 {strides = array<i32>} : memref<16x128xf32, #tpu.memory_space<vmem>>, vector<16x128xf32>,
    %c0_i32_8 = arith.constant 0 : i32
    %12 = arith.cmpi eq, %arg1, %c0_i32_8 : i32
    %13 = arith.extui %12 : i1 to i32
    %c0_i32_9 = arith.constant 0 : i32
    %14 = arith.cmpi ne, %13, %c0_i32_9 : i32
    scf.if %14 {
      %c0_10 = arith.constant 0 : index
      %c0_11 = arith.constant 0 : index
      %15 = vector.load %arg5[%c0_10, %c0_11] : memref<16x128xf32, #tpu.memory_space<vmem>>, vector<16x128xf32>
      %16 = vector.shape_cast %15 : vector<16x128xf32> to vector<1x16x128xf32>
      %cst_12 = arith.constant dense<0.000000e+00> : vector<1xf32>
      %17 = vector.multi_reduction <add>, %16, %cst_12 [1, 2] : vector<1x16x128xf32> to vector<1xf32>
      %18 = vector.shape_cast %17 : vector<1xf32> to vector<1x1x1xf32>
      %19 = vector.extract %18[0, 0, 0] : f32 from vector<1x1x1xf32>
      %c0_13 = arith.constant 0 : index
      %c0_14 = arith.constant 0 : index
      %20 = memref.load %arg4[%c0_13, %c0_14] : memref<1x1xf32, #tpu.memory_space<smem>>
      memref.store %19, %arg4[%c0_13, %c0_14] : memref<1x1xf32, #tpu.memory_space<smem>>
    } else {
    }
    return
  }
  func.func @transform_0(%arg0: i32, %arg1: i32) -> (i32, i32) {
    %c1_i32 = arith.constant 1 : i32
    %0 = arith.muli %arg0, %c1_i32 : i32
    %1 = arith.addi %0, %arg1 : i32
    %c0_i32 = arith.constant 0 : i32
    %2 = arith.minsi %1, %c0_i32 : i32
    %c0_i32_0 = arith.constant 0 : i32
    %c0_i32_1 = arith.constant 0 : i32
    return %2, %c0_i32_0 : i32, i32
  }
  func.func @transform_1(%arg0: i32, %arg1: i32) -> (i32, i32) {
    %c1_i32 = arith.constant 1 : i32
    %0 = arith.muli %arg0, %c1_i32 : i32
    %1 = arith.addi %0, %arg1 : i32
    %c0_i32 = arith.constant 0 : i32
    %2 = arith.minsi %1, %c0_i32 : i32
    %c0_i32_0 = arith.constant 0 : i32
    %c0_i32_1 = arith.constant 0 : i32
    return %2, %c0_i32_0 : i32, i32
  }
  func.func @transform_2(%arg0: i32, %arg1: i32) -> (i32, i32) {
    %c0_i32 = arith.constant 0 : i32
    %c0_i32_0 = arith.constant 0 : i32
    return %arg0, %c0_i32 : i32, i32
  }
}

</mosaic_0001>

<bundles_post_ra>
// kernel: tpu_custom_call.1
= control target key start
LH: loop header
LB: loop body
LE: loop exit
PB: predicated region body
PF: predicated region fallthrough
CT: control target
= control target key end

     0   :  { %7 = vsyncpa [#allocation4], 0  ;;  %s241_s0 = inlined_call_operand.hbm [shape: f32[16,128], index: 0, kind: input, shape index: {}]   ;;  %s242_s1 = inlined_call_operand.hbm [shape: f32[16,128], index: 1, kind: input, shape index: {}]   ;;  %s243_s2 = inlined_call_operand.hbm [shape: f32[1,1], index: 2, kind: output, shape index: {}]  }
   0x1   :  { %8 = vsyncpa [#allocation7], 0 }
   0x2   :  { %9 = vsyncpa [#allocation5], 0  ;;  %s185_s9 = smov [#allocation3]   ;;  %s125_s13 = scalar_lea.hbm %s241_s0, 256 }
   0x3   :  { %s21_s10 = sshll.u32 %s185_s9, 4  ;;  %p126_p0 = scmp.ne.s32.totalorder %s241_s0, %s125_s13  ;;  %s22_s10 = int_to_ptr.vmem [resolvable:$true] %s21_s10 }
   0x4   :  { %p129_p1 = scmp.lt.u32.totalorder %s125_s13, %s241_s0 }
   0x6   :  { %p131_p2 = pnand %p129_p1, %p126_p0 }
   0x8   :  { %134 = shalt.err (!%p131_p2)
}
   0x9   :  { %s135_s18 = scalar_lea.vmem %s22_s10, 256  ;;  %p140_p4 = scmp.lt.s32.totalorder %s22_s10, %s22_s10 }
   0xa   :  { %p136_p3 = scmp.ne.s32.totalorder %s22_s10, %s135_s18  ;;  %p141_p5 = scmp.lt.s32.totalorder %s135_s18, %s135_s18 }
   0xc   :  { %p142_p6 = por %p141_p5, %p140_p4 }
   0xe   :  { %p143_p7 = pnand %p142_p6, %p136_p3 }
  0x10   :  { %146 = shalt.err (!%p143_p7)
}
  0x11   :  { %s186_s19 = smov 128   ;;  %s187_s20 = smov 8  }
  0x12   :  { %27 = dma.hbm_to_vmem [thread:$0]  %s241_s0, 256, %s22_s10, [#allocation4], %s186_s19, %s186_s19, %s187_s20  }
  0x13   :  { %s188_s23 = smov [#allocation6]   ;;  %s147_s27 = scalar_lea.hbm %s242_s1, 256 }
  0x14   :  { %s39_s24 = sshll.u32 %s188_s23, 4  ;;  %p148_p8 = scmp.ne.s32.totalorder %s242_s1, %s147_s27  ;;  %s40_s24 = int_to_ptr.vmem [resolvable:$true] %s39_s24 }
  0x15   :  { %p151_p9 = scmp.lt.u32.totalorder %s147_s27, %s242_s1 }
  0x17   :  { %p153_p10 = pnand %p151_p9, %p148_p8 }
  0x19   :  { %156 = shalt.err (!%p153_p10)
}
  0x1a   :  { %s157_s4 = scalar_lea.vmem %s40_s24, 256  ;;  %p162_p12 = scmp.lt.s32.totalorder %s40_s24, %s40_s24 }
  0x1b   :  { %p158_p11 = scmp.ne.s32.totalorder %s40_s24, %s157_s4  ;;  %p163_p13 = scmp.lt.s32.totalorder %s157_s4, %s157_s4 }
  0x1d   :  { %p164_p0 = por %p163_p13, %p162_p12 }
  0x1f   :  { %p165_p1 = pnand %p164_p0, %p158_p11 }
  0x21   :  { %168 = shalt.err (!%p165_p1)
}
  0x22   :  { %45 = dma.hbm_to_vmem [thread:$0]  %s242_s1, 256, %s40_s24, [#allocation7], %s186_s19, %s186_s19, %s187_s20  }
  0x23   :  { %179 = dma.done.wait [#allocation4], 256  }
  0x24   :  { %180 = vsyncadd [#allocation4], 4294967040 }
  0x25   :  { %181 = dma.done.wait [#allocation7], 256  }
  0x26   :  { %182 = vsyncadd [#allocation7], 4294967040  ;;  %v66_v0 = vld [vmem:[#allocation3] sm:$0xff]  ;;  %v67_v1 = vld [vmem:[#allocation3 + $0x8] sm:$0xff]  ;;  %s169_s8 = scalar_lea.hbm %s243_s2, 16 }
  0x27   :  { %v68_v2 = vld [vmem:[#allocation6] sm:$0xff]  ;;  %v69_v3 = vld [vmem:[#allocation6 + $0x8] sm:$0xff]  ;;  %p170_p2 = scmp.ne.s32.totalorder %s243_s2, %s169_s8  ;;  %p173_p3 = scmp.lt.u32.totalorder %s169_s8, %s243_s2 }
  0x28   :  { %v70_v4 = vsub.f32 %v66_v0, %v68_v2  ;;  %v71_v5 = vsub.f32 %v67_v1, %v69_v3 }
  0x29   :  { %p175_p4 = pnand %p173_p3, %p170_p2 }
  0x2a   :  { %v72_v6 = vmul.f32 %v70_v4, %v70_v4  ;;  %v73_v7 = vmul.f32 %v71_v5, %v71_v5 }
  0x2c   :  { %v87_v8 = vadd.f32 %v73_v7, %v72_v6 }
  0x2e   :  { %88 = vadd.xlane.f32.xlu0 %v87_v8 }
  0xbb   :  { %v89_v9 = vpop.xlane.xlu0 %88 }
  0xbc   :  { %v90_v10 = vrot.slane %v89_v9, 4 }
  0xbe   :  { %v91_v11 = vadd.f32 %v90_v10, %v89_v9 }
  0xc0   :  { %v92_v12 = vrot.slane %v91_v11, 2 }
  0xc2   :  { %v93_v13 = vadd.f32 %v92_v12, %v91_v11 }
  0xc4   :  { %v94_v14 = vrot.slane %v93_v13, 1 }
  0xc6   :  { %v95_v15 = vadd.f32 %v94_v14, %v93_v13 }
  0xc8   :  { %118 = vpush %v95_v15 }
  0xf9   :  { %s119_s1 = spop %118 }
  0xfa   :  { %98 = sst [smem:[#allocation8]] %s119_s1 }
  0xfb   :  { %178 = shalt.err (!%p175_p4)
}
  0xfc   :  { %s189_s13 = smov [#allocation8]  }
  0xfd   :  { %106 = dma.smem_to_hbm %s189_s13, 16, %s243_s2, [#allocation5]  }
  0xfe   :  { %183 = dma.done.wait [#allocation5], 16  }
  0xff   :  { %184 = vsyncadd [#allocation5], 4294967280 }
 0x100   :  { %110 = sfence }
 0x101   :  { %111 = vsyncpa [#allocation4], 1 }
 0x102   :  { %112 = vsyncpa [#allocation7], 1 }
 0x103   :  { %113 = vsyncpa [#allocation5], 1 }

</bundles_post_ra>
